<compile_context>
chip_gen: v7x
topology: tpu7x:2x2x1
jax: 0.10.0
libtpu: 0.0.40
codegen_flags: <defaults>
</compile_context>

<pallas_src>
import functools

import jax
import jax.numpy as jnp
import numpy as np
from jax import lax
from jax.experimental import pallas as pl
from jax.experimental.pallas import tpu as pltpu

_NEG_INF = -1e30


def _round_up(x, m):
    return (x + m - 1) // m * m


# ---------------------------------------------------------------------------
# Fused kernel: embedding-as-one-hot-matmul + all conv filter sizes
#               (per-shift matmuls + aligned shifted adds) + mask/max/ReLU
#               + MLP head, per batch tile.
# ---------------------------------------------------------------------------
def _textcnn_kernel(tok_ref, ew_ref, mb_ref, w1_ref, b1_ref, w2_ref, b2_ref,
                    o_ref):
    bt, l_sub = tok_ref.shape                 # batch tile, padded seq length
    fs_max, v_pad, f_pad = ew_ref.shape       # shifts, padded vocab, padded filters
    n_rows = bt * l_sub

    # ---- vocab-wide one-hot, built ONCE.  Row order is t-major (r = t*bt+b):
    # the per-t lane slices below are static width-1 slices of the lane-dense
    # token block, and their concat along sublanes is bt-aligned (bt % 8 == 0).
    tok = tok_ref[...]                                            # (bt, l_sub) int32
    tok_col = jnp.concatenate(
        [tok[:, t:t + 1] for t in range(l_sub)], axis=0)          # (n_rows, 1)
    col = lax.broadcasted_iota(jnp.int32, (n_rows, v_pad), 1)
    # Single compare/select, single cast (exact 0/1 in bf16).  Kept int/f32 on
    # the VPU side for v5e friendliness; bf16 only feeds the MXU.
    oh = jnp.where(col == tok_col, 1.0, 0.0).astype(jnp.bfloat16)  # (n_rows, v_pad)

    # ---- conv for every filter size: fs_max matmuls (K = v_pad, f32 acc) whose
    # outputs are combined with tile-aligned shifted adds along the sequence.
    acc = jnp.zeros((n_rows, f_pad), jnp.float32)
    for i in range(fs_max):
        y = jnp.dot(oh, ew_ref[i], preferred_element_type=jnp.float32)
        if i:
            # row r = t*bt + b needs y at sequence position t+i -> shift by
            # i*bt rows (multiple of 8 -> no relayout).  Wrapped rows only land
            # on t > L - fs positions, which the -1e30 mask removes below.
            y = jnp.concatenate([y[i * bt:, :], y[:i * bt, :]], axis=0)
        acc = acc + y

    # ---- + conv bias, -1e30 on invalid tail positions, global max-pool over t,
    # ReLU hoisted after the max (relu(max(x)) == max(relu(x)), relu monotone).
    conv = acc.reshape(l_sub, bt, f_pad) + mb_ref[...]            # mb: (l_sub,1,f_pad)
    pooled = jnp.maximum(jnp.max(conv, axis=0), 0.0)              # (bt, f_pad) f32

    # ---- MLP head (f32): Linear -> ReLU -> Linear (bias=True, no BN, no dropout).
    h = jnp.dot(pooled, w1_ref[...],
                preferred_element_type=jnp.float32) + b1_ref[...]
    h = jnp.maximum(h, 0.0)
    o_ref[...] = jnp.dot(h, w2_ref[...],
                         preferred_element_type=jnp.float32) + b2_ref[...]


# ---------------------------------------------------------------------------
# Wrapper: weight folding (weight-only, constant-folded under jit), lane-dense
# token layout, batch-tiled 1-D grid, single pallas_call.
# ---------------------------------------------------------------------------
def textcnn_forward(tokens, params, *, block_b=128):
    emb = params["embedding"]                        # (V, E) f32
    convs = params["convs"]                          # [(w (fs,E,Fj), b (Fj,)), ...]
    w1, b1, w2, b2 = params["w1"], params["b1"], params["w2"], params["b2"]

    vocab = int(emb.shape[0])
    batch, seq_len = tokens.shape
    fs_list = [int(w.shape[0]) for w, _ in convs]
    fn_list = [int(w.shape[2]) for w, _ in convs]
    fs_max = max(fs_list)
    f_total = sum(fn_list)
    hidden = int(w1.shape[1])
    n_class = int(w2.shape[1])
    assert seq_len >= fs_max, "sequence shorter than the largest filter"

    v_pad = _round_up(vocab, 128)                    # lane-dense one-hot / EW rows
    f_pad = _round_up(f_total, 128)                  # lane-dense feature width
    c_pad = _round_up(n_class, 128)                  # lane-dense logits
    l_sub = _round_up(seq_len, 8)                    # sublane-aligned sequence

    # --- weight-only folding: EW[i] = emb @ W_i (zero for filters shorter than
    # shift i), all filter sizes concatenated on the feature axis. ------------
    ew_slices = []
    for i in range(fs_max):
        blocks = []
        for (w, _), fs in zip(convs, fs_list):
            if i < fs:
                blocks.append(jnp.dot(emb, w[i]))                    # (V, Fj) f32
            else:
                blocks.append(jnp.zeros((vocab, int(w.shape[2])), jnp.float32))
        ew_slices.append(jnp.concatenate(blocks, axis=1))            # (V, f_total)
    ew = jnp.stack(ew_slices, axis=0)                                # (fs_max, V, f_total)
    ew = jnp.pad(ew, ((0, 0), (0, v_pad - vocab), (0, f_pad - f_total)))
    ew = ew.astype(jnp.bfloat16)
    # TODO(synk): for large vocabularies, replace the one-hot matmul with a
    # scalar-prefetched DMA/row gather of EW (or gather embeddings and use a
    # K = fs_max*E im2col matmul) so VPU/VMEM cost stops scaling with V.

    # conv bias + validity mask folded into one additive (l_sub, 1, f_pad) term:
    # position t is valid for a size-fs filter iff t <= L - fs (covers the
    # sequence padding and the wrapped rows from the shifted adds).
    bias_c = jnp.concatenate([b for _, b in convs])                  # (f_total,)
    limits = np.repeat(np.array([seq_len - fs for fs in fs_list]), fn_list)
    valid = np.arange(l_sub)[:, None] <= limits[None, :]
    mask = np.where(valid, 0.0, _NEG_INF).astype(np.float32)         # (l_sub, f_total)
    mb = jnp.asarray(mask) + bias_c[None, :]
    mb = jnp.pad(mb, ((0, 0), (0, f_pad - f_total))).reshape(l_sub, 1, f_pad)

    w1p = jnp.pad(w1, ((0, f_pad - f_total), (0, 0)))                # (f_pad, H)
    b1r = b1.reshape(1, hidden)
    w2p = jnp.pad(w2, ((0, 0), (0, c_pad - n_class)))                # (H, c_pad)
    b2r = jnp.pad(b2.reshape(1, n_class), ((0, 0), (0, c_pad - n_class)))

    # --- lane-dense tokens: (b_pad, l_sub) int32, tail padded with id 0 (those
    # positions are masked); batch padded to a multiple of the tile. ----------
    bt = min(block_b, _round_up(batch, 8))
    b_pad = _round_up(batch, bt)
    tok = jnp.pad(tokens.astype(jnp.int32),
                  ((0, b_pad - batch), (0, l_sub - seq_len)))
    # TODO(synk): for very long sequences, move the per-t one-hot build into a
    # fori_loop / extra grid axis instead of the unrolled Python loop.

    grid = (b_pad // bt,)
    out = pl.pallas_call(
        _textcnn_kernel,
        out_shape=jax.ShapeDtypeStruct((b_pad, c_pad), jnp.float32),
        grid=grid,
        in_specs=[
            pl.BlockSpec((bt, l_sub), lambda n: (n, 0)),
            pl.BlockSpec((fs_max, v_pad, f_pad), lambda n: (0, 0, 0)),
            pl.BlockSpec((l_sub, 1, f_pad), lambda n: (0, 0, 0)),
            pl.BlockSpec((f_pad, hidden), lambda n: (0, 0)),
            pl.BlockSpec((1, hidden), lambda n: (0, 0)),
            pl.BlockSpec((hidden, c_pad), lambda n: (0, 0)),
            pl.BlockSpec((1, c_pad), lambda n: (0, 0)),
        ],
        out_specs=pl.BlockSpec((bt, c_pad), lambda n: (n, 0)),
        compiler_params=pltpu.CompilerParams(
            dimension_semantics=("parallel",)),
    )(tok, ew, mb, w1p, b1r, w2p, b2r)
    return out[:batch, :n_class]
    # TODO(synk): add_feature(feature) concat and the batch_norm=True head
    # branch are not implemented (mirrored config: feature=None, batch_norm=False).


# ---------------------------------------------------------------------------
# Pure-JAX f32 reference with the PyTorch module's semantics (for validation).
# ---------------------------------------------------------------------------
def textcnn_reference(tokens, params):
    x = jnp.take(params["embedding"], tokens, axis=0)         # (B, L, E)
    seq_len = x.shape[1]
    feats = []
    for w, b in params["convs"]:
        fs = w.shape[0]
        t_out = seq_len - fs + 1
        windows = jnp.stack([x[:, t:t + fs, :] for t in range(t_out)], axis=1)
        conv = jnp.einsum("btfe,fek->btk", windows, w) + b     # (B, T, Fj)
        feats.append(jnp.max(jax.nn.relu(conv), axis=1))       # (B, Fj)
    feat = jnp.concatenate(feats, axis=1)                      # (B, sum Fj)
    h = jax.nn.relu(feat @ params["w1"] + params["b1"])
    return h @ params["w2"] + params["b2"]


# ---------------------------------------------------------------------------
# Deterministic parameter init + demo run.
# ---------------------------------------------------------------------------
def init_params(key, vocab_size, dim_embedding, filter_size_list,
                filter_num_list, hidden, num_class):
    # Mirror the module: single-entry filter_num_list broadcasts over sizes,
    # hiddens=[-1, hidden] -> [sum(filter_num_list), hidden] (+ num_class).
    if len(filter_num_list) == 1:
        filter_num_list = filter_num_list * len(filter_size_list)
    keys = jax.random.split(key, 4 + 2 * len(filter_size_list))
    params = {"embedding": jax.random.normal(
        keys[0], (vocab_size, dim_embedding), jnp.float32) * 0.1}
    convs = []
    for i, fs in enumerate(filter_size_list):
        fn = filter_num_list[i]
        w = jax.random.normal(keys[1 + 2 * i], (fs, dim_embedding, fn),
                              jnp.float32) * 0.1
        b = jax.random.normal(keys[2 + 2 * i], (fn,), jnp.float32) * 0.01
        convs.append((w, b))
    params["convs"] = convs
    c_in = sum(filter_num_list)
    params["w1"] = jax.random.normal(keys[-3], (c_in, hidden), jnp.float32) * 0.1
    params["b1"] = jax.random.normal(keys[-2], (hidden,), jnp.float32) * 0.01
    params["w2"] = jax.random.normal(keys[-1], (hidden, num_class),
                                     jnp.float32) * 0.1
    params["b2"] = jnp.zeros((num_class,), jnp.float32)
    return params


if __name__ == "__main__":
    B, L = 2, 16
    vocab_size, dim_embedding = 50, 32
    filter_size_list = [3, 4, 5]
    filter_num_list = [8]          # broadcasts to [8, 8, 8] as in the module
    hidden, num_class = 32, 4

    key = jax.random.PRNGKey(0)
    k_tok, k_par = jax.random.split(key)
    tokens = jax.random.randint(k_tok, (B, L), 0, vocab_size, dtype=jnp.int32)
    params = init_params(k_par, vocab_size, dim_embedding,
                         filter_size_list, filter_num_list, hidden, num_class)

    fwd = jax.jit(functools.partial(textcnn_forward, params=params))
    logits = fwd(tokens)
    jax.block_until_ready(logits)
    assert logits.shape == (B, num_class), logits.shape

    ref = textcnn_reference(tokens, params)
    max_err = float(jnp.max(jnp.abs(logits - ref)))
    assert max_err < 5e-2, f"kernel/reference mismatch: max abs err {max_err}"
    print("KERNEL_OK")
</pallas_src>

<mosaic_0001>
module attributes {stable_mosaic.version = 11 : i64} {
  func.func @_textcnn_kernel(%arg0: i32, %arg1: memref<8x16xi32, #tpu.memory_space<vmem>>, %arg2: memref<5x128x128xbf16, #tpu.memory_space<vmem>>, %arg3: memref<16x1x128xf32, #tpu.memory_space<vmem>>, %arg4: memref<128x32xf32, #tpu.memory_space<vmem>>, %arg5: memref<1x32xf32, #tpu.memory_space<vmem>>, %arg6: memref<32x128xf32, #tpu.memory_space<vmem>>, %arg7: memref<1x128xf32, #tpu.memory_space<vmem>>, %arg8: memref<8x128xf32, #tpu.memory_space<vmem>>) attributes {dimension_semantics = [#tpu.dimension_semantics<parallel>], iteration_bounds = array<i64: 1>, scalar_prefetch = 0 : i64, scratch_operands = 0 : i64, tpu.core_type = #tpu.core_type<tc>, window_params = [{transform_indices = @transform_0, window_bounds = array<i64: 8, 16>}, {pipeline_mode = #tpu.pipeline_mode<synchronous>, transform_indices = @transform_1, window_bounds = array<i64: 5, 128, 128>}, {pipeline_mode = #tpu.pipeline_mode<synchronous>, transform_indices = @transform_2, window_bounds = array<i64: 16, 1, 128>}, {pipeline_mode = #tpu.pipeline_mode<synchronous>, transform_indices = @transform_3, window_bounds = array<i64: 128, 32>}, {pipeline_mode = #tpu.pipeline_mode<synchronous>, transform_indices = @transform_4, window_bounds = array<i64: 1, 32>}, {pipeline_mode = #tpu.pipeline_mode<synchronous>, transform_indices = @transform_5, window_bounds = array<i64: 32, 128>}, {pipeline_mode = #tpu.pipeline_mode<synchronous>, transform_indices = @transform_6, window_bounds = array<i64: 1, 128>}, {transform_indices = @transform_7, window_bounds = array<i64: 8, 128>}]} {
    %c0 = arith.constant 0 : index
    %c0_0 = arith.constant 0 : index
    %0 = vector.load %arg1[%c0, %c0_0] : memref<8x16xi32, #tpu.memory_space<vmem>>, vector<8x16xi32>
    %1 = vector.extract_strided_slice %0 {offsets = [0, 0], sizes = [8, 1], strides = [1, 1]} : vector<8x16xi32> to vector<8x1xi32>
    %2 = vector.extract_strided_slice %0 {offsets = [0, 1], sizes = [8, 1], strides = [1, 1]} : vector<8x16xi32> to vector<8x1xi32>
    %3 = vector.extract_strided_slice %0 {offsets = [0, 2], sizes = [8, 1], strides = [1, 1]} : vector<8x16xi32> to vector<8x1xi32>
    %4 = vector.extract_strided_slice %0 {offsets = [0, 3], sizes = [8, 1], strides = [1, 1]} : vector<8x16xi32> to vector<8x1xi32>
    %5 = vector.extract_strided_slice %0 {offsets = [0, 4], sizes = [8, 1], strides = [1, 1]} : vector<8x16xi32> to vector<8x1xi32>
    %6 = vector.extract_strided_slice %0 {offsets = [0, 5], sizes = [8, 1], strides = [1, 1]} : vector<8x16xi32> to vector<8x1xi32>
    %7 = vector.extract_strided_slice %0 {offsets = [0, 6], sizes = [8, 1], strides = [1, 1]} : vector<8x16xi32> to vector<8x1xi32>
    %8 = vector.extract_strided_slice %0 {offsets = [0, 7], sizes = [8, 1], strides = [1, 1]} : vector<8x16xi32> to vector<8x1xi32>
    %9 = vector.extract_strided_slice %0 {offsets = [0, 8], sizes = [8, 1], strides = [1, 1]} : vector<8x16xi32> to vector<8x1xi32>
    %10 = vector.extract_strided_slice %0 {offsets = [0, 9], sizes = [8, 1], strides = [1, 1]} : vector<8x16xi32> to vector<8x1xi32>
    %11 = vector.extract_strided_slice %0 {offsets = [0, 10], sizes = [8, 1], strides = [1, 1]} : vector<8x16xi32> to vector<8x1xi32>
    %12 = vector.extract_strided_slice %0 {offsets = [0, 11], sizes = [8, 1], strides = [1, 1]} : vector<8x16xi32> to vector<8x1xi32>
    %13 = vector.extract_strided_slice %0 {offsets = [0, 12], sizes = [8, 1], strides = [1, 1]} : vector<8x16xi32> to vector<8x1xi32>
    %14 = vector.extract_strided_slice %0 {offsets = [0, 13], sizes = [8, 1], strides = [1, 1]} : vector<8x16xi32> to vector<8x1xi32>
    %15 = vector.extract_strided_slice %0 {offsets = [0, 14], sizes = [8, 1], strides = [1, 1]} : vector<8x16xi32> to vector<8x1xi32>
    %16 = vector.extract_strided_slice %0 {offsets = [0, 15], sizes = [8, 1], strides = [1, 1]} : vector<8x16xi32> to vector<8x1xi32>
    %17 = tpu.concatenate %1, %2, %3, %4, %5, %6, %7, %8, %9, %10, %11, %12, %13, %14, %15, %16 in 0 : vector<8x1xi32>, vector<8x1xi32>, vector<8x1xi32>, vector<8x1xi32>, vector<8x1xi32>, vector<8x1xi32>, vector<8x1xi32>, vector<8x1xi32>, vector<8x1xi32>, vector<8x1xi32>, vector<8x1xi32>, vector<8x1xi32>, vector<8x1xi32>, vector<8x1xi32>, vector<8x1xi32>, vector<8x1xi32> -> vector<128x1xi32>
    %18 = tpu.iota {dimensions = array<i32: 1>} : vector<128x128xi32>
    %19 = vector.broadcast %17 : vector<128x1xi32> to vector<128x128xi32>
    %20 = arith.cmpi eq, %18, %19 : vector<128x128xi32>
    %cst = arith.constant 1.000000e+00 : f32
    %cst_1 = arith.constant 0.000000e+00 : f32
    %21 = vector.broadcast %cst : f32 to vector<128x128xf32>
    %22 = vector.broadcast %cst_1 : f32 to vector<128x128xf32>
    %23 = arith.select %20, %21, %22 : vector<128x128xi1>, vector<128x128xf32>
    %24 = arith.truncf %23 : vector<128x128xf32> to vector<128x128xbf16>
    %cst_2 = arith.constant 0.000000e+00 : f32
    %25 = vector.broadcast %cst_2 : f32 to vector<128x128xf32>
    %c0_3 = arith.constant 0 : index
    %c0_4 = arith.constant 0 : index
    %c0_5 = arith.constant 0 : index
    %26 = vector.load %arg2[%c0_3, %c0_4, %c0_5] : memref<5x128x128xbf16, #tpu.memory_space<vmem>>, vector<1x128x128xbf16>
    %27 = vector.shape_cast %26 : vector<1x128x128xbf16> to vector<128x128xbf16>
    %cst_6 = arith.constant dense<0.000000e+00> : vector<128x128xf32>
    %28 = tpu.matmul %24, %27, %cst_6 {dimension_numbers = #tpu.dot_dimension_numbers<[1], [0], [0], [1], [0, 0, 1, 1], [], []>} : vector<128x128xbf16>, vector<128x128xbf16>, vector<128x128xf32> -> vector<128x128xf32>
    %29 = arith.addf %25, %28 : vector<128x128xf32>
    %c1 = arith.constant 1 : index
    %c0_7 = arith.constant 0 : index
    %c0_8 = arith.constant 0 : index
    %30 = vector.load %arg2[%c1, %c0_7, %c0_8] : memref<5x128x128xbf16, #tpu.memory_space<vmem>>, vector<1x128x128xbf16>
    %31 = vector.shape_cast %30 : vector<1x128x128xbf16> to vector<128x128xbf16>
    %cst_9 = arith.constant dense<0.000000e+00> : vector<128x128xf32>
    %32 = tpu.matmul %24, %31, %cst_9 {dimension_numbers = #tpu.dot_dimension_numbers<[1], [0], [0], [1], [0, 0, 1, 1], [], []>} : vector<128x128xbf16>, vector<128x128xbf16>, vector<128x128xf32> -> vector<128x128xf32>
    %33 = vector.extract_strided_slice %32 {offsets = [8, 0], sizes = [120, 128], strides = [1, 1]} : vector<128x128xf32> to vector<120x128xf32>
    %34 = vector.extract_strided_slice %32 {offsets = [0, 0], sizes = [8, 128], strides = [1, 1]} : vector<128x128xf32> to vector<8x128xf32>
    %35 = tpu.concatenate %33, %34 in 0 : vector<120x128xf32>, vector<8x128xf32> -> vector<128x128xf32>
    %36 = arith.addf %29, %35 : vector<128x128xf32>
    %c2 = arith.constant 2 : index
    %c0_10 = arith.constant 0 : index
    %c0_11 = arith.constant 0 : index
    %37 = vector.load %arg2[%c2, %c0_10, %c0_11] : memref<5x128x128xbf16, #tpu.memory_space<vmem>>, vector<1x128x128xbf16>
    %38 = vector.shape_cast %37 : vector<1x128x128xbf16> to vector<128x128xbf16>
    %cst_12 = arith.constant dense<0.000000e+00> : vector<128x128xf32>
    %39 = tpu.matmul %24, %38, %cst_12 {dimension_numbers = #tpu.dot_dimension_numbers<[1], [0], [0], [1], [0, 0, 1, 1], [], []>} : vector<128x128xbf16>, vector<128x128xbf16>, vector<128x128xf32> -> vector<128x128xf32>
    %40 = vector.extract_strided_slice %39 {offsets = [16, 0], sizes = [112, 128], strides = [1, 1]} : vector<128x128xf32> to vector<112x128xf32>
    %41 = vector.extract_strided_slice %39 {offsets = [0, 0], sizes = [16, 128], strides = [1, 1]} : vector<128x128xf32> to vector<16x128xf32>
    %42 = tpu.concatenate %40, %41 in 0 : vector<112x128xf32>, vector<16x128xf32> -> vector<128x128xf32>
    %43 = arith.addf %36, %42 : vector<128x128xf32>
    %c3 = arith.constant 3 : index
    %c0_13 = arith.constant 0 : index
    %c0_14 = arith.constant 0 : index
    %44 = vector.load %arg2[%c3, %c0_13, %c0_14] : memref<5x128x128xbf16, #tpu.memory_space<vmem>>, vector<1x128x128xbf16>
    %45 = vector.shape_cast %44 : vector<1x128x128xbf16> to vector<128x128xbf16>
    %cst_15 = arith.constant dense<0.000000e+00> : vector<128x128xf32>
    %46 = tpu.matmul %24, %45, %cst_15 {dimension_numbers = #tpu.dot_dimension_numbers<[1], [0], [0], [1], [0, 0, 1, 1], [], []>} : vector<128x128xbf16>, vector<128x128xbf16>, vector<128x128xf32> -> vector<128x128xf32>
    %47 = vector.extract_strided_slice %46 {offsets = [24, 0], sizes = [104, 128], strides = [1, 1]} : vector<128x128xf32> to vector<104x128xf32>
    %48 = vector.extract_strided_slice %46 {offsets = [0, 0], sizes = [24, 128], strides = [1, 1]} : vector<128x128xf32> to vector<24x128xf32>
    %49 = tpu.concatenate %47, %48 in 0 : vector<104x128xf32>, vector<24x128xf32> -> vector<128x128xf32>
    %50 = arith.addf %43, %49 : vector<128x128xf32>
    %c4 = arith.constant 4 : index
    %c0_16 = arith.constant 0 : index
    %c0_17 = arith.constant 0 : index
    %51 = vector.load %arg2[%c4, %c0_16, %c0_17] : memref<5x128x128xbf16, #tpu.memory_space<vmem>>, vector<1x128x128xbf16>
    %52 = vector.shape_cast %51 : vector<1x128x128xbf16> to vector<128x128xbf16>
    %cst_18 = arith.constant dense<0.000000e+00> : vector<128x128xf32>
    %53 = tpu.matmul %24, %52, %cst_18 {dimension_numbers = #tpu.dot_dimension_numbers<[1], [0], [0], [1], [0, 0, 1, 1], [], []>} : vector<128x128xbf16>, vector<128x128xbf16>, vector<128x128xf32> -> vector<128x128xf32>
    %54 = vector.extract_strided_slice %53 {offsets = [32, 0], sizes = [96, 128], strides = [1, 1]} : vector<128x128xf32> to vector<96x128xf32>
    %55 = vector.extract_strided_slice %53 {offsets = [0, 0], sizes = [32, 128], strides = [1, 1]} : vector<128x128xf32> to vector<32x128xf32>
    %56 = tpu.concatenate %54, %55 in 0 : vector<96x128xf32>, vector<32x128xf32> -> vector<128x128xf32>
    %57 = arith.addf %50, %56 : vector<128x128xf32>
    %58 = vector.shape_cast %57 : vector<128x128xf32> to vector<16x8x128xf32>
    %c0_19 = arith.constant 0 : index
    %c0_20 = arith.constant 0 : index
    %c0_21 = arith.constant 0 : index
    %59 = vector.load %arg3[%c0_19, %c0_20, %c0_21] : memref<16x1x128xf32, #tpu.memory_space<vmem>>, vector<16x1x128xf32>
    %60 = vector.broadcast %59 : vector<16x1x128xf32> to vector<16x8x128xf32>
    %61 = arith.addf %58, %60 : vector<16x8x128xf32>
    %cst_22 = arith.constant dense<0xFF800000> : vector<8x128xf32>
    %62 = vector.multi_reduction <maximumf>, %61, %cst_22 [0] : vector<16x8x128xf32> to vector<8x128xf32>
    %cst_23 = arith.constant 0.000000e+00 : f32
    %63 = vector.broadcast %cst_23 : f32 to vector<8x128xf32>
    %64 = arith.maximumf %62, %63 : vector<8x128xf32>
    %c0_24 = arith.constant 0 : index
    %c0_25 = arith.constant 0 : index
    %65 = vector.load %arg4[%c0_24, %c0_25] : memref<128x32xf32, #tpu.memory_space<vmem>>, vector<128x32xf32>
    %cst_26 = arith.constant dense<0.000000e+00> : vector<8x32xf32>
    %66 = tpu.matmul %64, %65, %cst_26 {dimension_numbers = #tpu.dot_dimension_numbers<[1], [0], [0], [1], [0, 0, 1, 1], [], []>} : vector<8x128xf32>, vector<128x32xf32>, vector<8x32xf32> -> vector<8x32xf32>
    %c0_27 = arith.constant 0 : index
    %c0_28 = arith.constant 0 : index
    %67 = vector.load %arg5[%c0_27, %c0_28] : memref<1x32xf32, #tpu.memory_space<vmem>>, vector<1x32xf32>
    %68 = vector.broadcast %67 : vector<1x32xf32> to vector<8x32xf32>
    %69 = arith.addf %66, %68 : vector<8x32xf32>
    %cst_29 = arith.constant 0.000000e+00 : f32
    %70 = vector.broadcast %cst_29 : f32 to vector<8x32xf32>
    %71 = arith.maximumf %69, %70 : vector<8x32xf32>
    %c0_30 = arith.constant 0 : index
    %c0_31 = arith.constant 0 : index
    %72 = vector.load %arg6[%c0_30, %c0_31] : memref<32x128xf32, #tpu.memory_space<vmem>>, vector<32x128xf32>
    %cst_32 = arith.constant dense<0.000000e+00> : vector<8x128xf32>
    %73 = tpu.matmul %71, %72, %cst_32 {dimension_numbers = #tpu.dot_dimension_numbers<[1], [0], [0], [1], [0, 0, 1, 1], [], []>} : vector<8x32xf32>, vector<32x128xf32>, vector<8x128xf32> -> vector<8x128xf32>
    %c0_33 = arith.constant 0 : index
    %c0_34 = arith.constant 0 : index
    %74 = vector.load %arg7[%c0_33, %c0_34] : memref<1x128xf32, #tpu.memory_space<vmem>>, vector<1x128xf32>
    %75 = vector.broadcast %74 : vector<1x128xf32> to vector<8x128xf32>
    %76 = arith.addf %73, %75 : vector<8x128xf32>
    %c0_35 = arith.constant 0 : index
    %c0_36 = arith.constant 0 : index
    %77 = vector.load %arg8[%c0_35, %c0_36] : memref<8x128xf32, #tpu.memory_space<vmem>>, vector<8x128xf32>
    tpu.vector_store %arg8[%c0_35, %c0_36], %76 {strides = array<i32>} : memref<8x128xf32, #tpu.memory_space<vmem>>, vector<8x128xf32>,
    return
  }
  func.func @transform_0(%arg0: i32) -> (i32, i32) {
    %c0_i32 = arith.constant 0 : i32
    %c0_i32_0 = arith.constant 0 : i32
    return %arg0, %c0_i32 : i32, i32
  }
  func.func @transform_1(%arg0: i32) -> (i32, i32, i32) {
    %c0_i32 = arith.constant 0 : i32
    %c0_i32_0 = arith.constant 0 : i32
    %c0_i32_1 = arith.constant 0 : i32
    %c0_i32_2 = arith.constant 0 : i32
    return %c0_i32, %c0_i32_0, %c0_i32_1 : i32, i32, i32
  }
  func.func @transform_2(%arg0: i32) -> (i32, i32, i32) {
    %c0_i32 = arith.constant 0 : i32
    %c0_i32_0 = arith.constant 0 : i32
    %c0_i32_1 = arith.constant 0 : i32
    %c0_i32_2 = arith.constant 0 : i32
    return %c0_i32, %c0_i32_0, %c0_i32_1 : i32, i32, i32
  }
  func.func @transform_3(%arg0: i32) -> (i32, i32) {
    %c0_i32 = arith.constant 0 : i32
    %c0_i32_0 = arith.constant 0 : i32
    %c0_i32_1 = arith.constant 0 : i32
    return %c0_i32, %c0_i32_0 : i32, i32
  }
  func.func @transform_4(%arg0: i32) -> (i32, i32) {
    %c0_i32 = arith.constant 0 : i32
    %c0_i32_0 = arith.constant 0 : i32
    %c0_i32_1 = arith.constant 0 : i32
    return %c0_i32, %c0_i32_0 : i32, i32
  }
  func.func @transform_5(%arg0: i32) -> (i32, i32) {
    %c0_i32 = arith.constant 0 : i32
    %c0_i32_0 = arith.constant 0 : i32
    %c0_i32_1 = arith.constant 0 : i32
    return %c0_i32, %c0_i32_0 : i32, i32
  }
  func.func @transform_6(%arg0: i32) -> (i32, i32) {
    %c0_i32 = arith.constant 0 : i32
    %c0_i32_0 = arith.constant 0 : i32
    %c0_i32_1 = arith.constant 0 : i32
    return %c0_i32, %c0_i32_0 : i32, i32
  }
  func.func @transform_7(%arg0: i32) -> (i32, i32) {
    %c0_i32 = arith.constant 0 : i32
    %c0_i32_0 = arith.constant 0 : i32
    return %arg0, %c0_i32 : i32, i32
  }
}

</mosaic_0001>

<bundles_post_ra>
// kernel: textcnn_forward.1
= control target key start
LH: loop header
LB: loop body
LE: loop exit
PB: predicated region body
PF: predicated region fallthrough
CT: control target
= control target key end

     0   :  { %12 = vsyncpa [#allocation3], 0  ;;  %s2334_s0 = inlined_call_operand.vmem [shape: s32[8,16], index: 0, kind: input, shape index: {}]   ;;  %s2335_s1 = inlined_call_operand.hbm [shape: bf16[5,128,128], index: 1, kind: input, shape index: {}]   ;;  %s2336_s2 = inlined_call_operand.hbm [shape: f32[16,1,128], index: 2, kind: input, shape index: {}]   ;;  %s2337_s3 = inlined_call_operand.hbm [shape: f32[128,32], index: 3, kind: input, shape index: {}]   ;;  %s2338_s4 = inlined_call_operand.vmem [shape: f32[1,32], index: 4, kind: input, shape index: {}]   ;;  %s2339_s5 = inlined_call_operand.vmem [shape: f32[32,128], index: 5, kind: input, shape index: {}]   ;;  %s2340_s6 = inlined_call_operand.vmem [shape: f32[1,128], index: 6, kind: input, shape index: {}]   ;;  %s2341_s7 = inlined_call_operand.vmem [shape: f32[8,128], index: 7, kind: output, shape index: {}]  }
   0x1   :  { %13 = vsyncpa [#allocation5], 0  ;;  %s1994_s24 = smov [#allocation4]   ;;  %s1924_s28 = scalar_lea.hbm %s2336_s2, 256 }
   0x2   :  { %s33_s25 = sshll.u32 %s1994_s24, 4  ;;  %p1925_p0 = scmp.ne.s32.totalorder %s2336_s2, %s1924_s28  ;;  %s34_s25 = int_to_ptr.vmem [resolvable:$true] %s33_s25 }
   0x3   :  { %p1928_p1 = scmp.lt.u32.totalorder %s1924_s28, %s2336_s2 }
   0x5   :  { %p1930_p2 = pnand %p1928_p1, %p1925_p0 }
   0x7   :  { %1933 = shalt.err (!%p1930_p2)
}
   0x8   :  { %s1934_s10 = scalar_lea.vmem %s34_s25, 256  ;;  %p1939_p4 = scmp.lt.s32.totalorder %s34_s25, %s34_s25 }
   0x9   :  { %p1935_p3 = scmp.ne.s32.totalorder %s34_s25, %s1934_s10  ;;  %p1940_p5 = scmp.lt.s32.totalorder %s1934_s10, %s1934_s10 }
   0xb   :  { %p1941_p6 = por %p1940_p5, %p1939_p4 }
   0xd   :  { %p1942_p7 = pnand %p1941_p6, %p1935_p3 }
   0xf   :  { %1945 = shalt.err (!%p1942_p7)
}
  0x10   :  { %s1995_s11 = smov 16   ;;  %s1996_s12 = smov 1  }
  0x11   :  { %39 = dma.hbm_to_vmem [thread:$0]  %s2336_s2, 256, %s34_s25, [#allocation5], %s1995_s11, %s1995_s11, %s1996_s12  }
  0x12   :  { %s1997_s15 = smov [#allocation2]   ;;  %s1946_s19 = scalar_lea.hbm %s2335_s1, 5120 }
  0x13   :  { %s21_s16 = sshll.u32 %s1997_s15, 4  ;;  %p1947_p8 = scmp.ne.s32.totalorder %s2335_s1, %s1946_s19  ;;  %s22_s16 = int_to_ptr.vmem [resolvable:$true] %s21_s16 }
  0x14   :  { %p1950_p9 = scmp.lt.u32.totalorder %s1946_s19, %s2335_s1 }
  0x16   :  { %p1952_p10 = pnand %p1950_p9, %p1947_p8 }
  0x18   :  { %1955 = shalt.err (!%p1952_p10)
}
  0x19   :  { %s1956_s24 = scalar_lea.vmem %s22_s16, 5120  ;;  %p1961_p12 = scmp.lt.s32.totalorder %s22_s16, %s22_s16 }
  0x1a   :  { %p1957_p11 = scmp.ne.s32.totalorder %s22_s16, %s1956_s24  ;;  %p1962_p13 = scmp.lt.s32.totalorder %s1956_s24, %s1956_s24 }
  0x1c   :  { %p1963_p0 = por %p1962_p13, %p1961_p12 }
  0x1e   :  { %p1964_p1 = pnand %p1963_p0, %p1957_p11 }
  0x20   :  { %1967 = shalt.err (!%p1964_p1)
}
  0x21   :  { %s1998_s2 = smov 64   ;;  %s1999_s25 = smov 4  }
  0x22   :  { %27 = dma.hbm_to_vmem [thread:$0]  %s2335_s1, 5120, %s22_s16, [#allocation3], %s1998_s2, %s1998_s2, %s1999_s25  }
  0x23   :  { %s2000_s28 = smov [#allocation6]   ;;  %s1968_s9 = scalar_lea.hbm %s2337_s3, 2048 }
  0x24   :  { %s45_s29 = sshll.u32 %s2000_s28, 4  ;;  %p1969_p2 = scmp.ne.s32.totalorder %s2337_s3, %s1968_s9  ;;  %s46_s29 = int_to_ptr.vmem [resolvable:$true] %s45_s29 }
  0x25   :  { %p1972_p3 = scmp.lt.u32.totalorder %s1968_s9, %s2337_s3 }
  0x27   :  { %p1974_p4 = pnand %p1972_p3, %p1969_p2 }
  0x29   :  { %1977 = shalt.err (!%p1974_p4)
}
  0x2a   :  { %s1978_s14 = scalar_lea.vmem %s46_s29, 2048  ;;  %p1983_p6 = scmp.lt.s32.totalorder %s46_s29, %s46_s29 }
  0x2b   :  { %p1979_p5 = scmp.ne.s32.totalorder %s46_s29, %s1978_s14  ;;  %p1984_p7 = scmp.lt.s32.totalorder %s1978_s14, %s1978_s14 }
  0x2d   :  { %p1985_p8 = por %p1984_p7, %p1983_p6 }
  0x2f   :  { %p1986_p9 = pnand %p1985_p8, %p1979_p5 }
  0x31   :  { %1989 = shalt.err (!%p1986_p9)
}
  0x32   :  { %s2001_s1 = smov 128   ;;  %s2002_s15 = smov 8  }
  0x33   :  { %51 = dma.hbm_to_vmem [thread:$0]  %s2337_s3, 2048, %s46_s29, [#allocation5], %s2001_s1, %s2001_s1, %s2002_s15  }
  0x34   :  { %1990 = dma.done.wait [#allocation3], 5120  }
  0x35   :  { %1991 = vsyncadd [#allocation3], 4294962176 }
  0x36   :  { %1992 = dma.done.wait [#allocation5], 2304  }
  0x37   :  { %1993 = vsyncadd [#allocation5], 4294964992  ;;  %v2003_v0 = vmov 0   ;;  %v68_v1 = vld [vmem:[%s2334_s0] sm:$0xff]  ;;  %s2004_s20 = smov 125   ;;  %s2005_s21 = smov 127   ;;  %v99_v35 = vlaneseq }
  0x38   :  { %1883 = vset.pattern.permute.xlu0 %v2003_v0  ;;  %1882 = vset.pattern.permute.xlu1 %v2003_v0  ;;  %s2006_s22 = smov 124   ;;  %s2007_s23 = smov 126   ;;  %v1884_v2 = vld [vmem:[#allocation2 + $0x40] sm:$0xff]   ;;  %v1886_v4 = vld [vmem:[#allocation2 + $0x48] sm:$0xff]   ;;  %v1888_v6 = vld [vmem:[#allocation2 + $0x50] sm:$0xff]  }
  0x39   :  { %73 = vrot.lane.b32.xlu1 %v68_v1, %s2004_s20  ;;  %69 = vrot.lane.b32.xlu0 %v68_v1, %s2005_s21  ;;  %s2008_s3 = smov 122   ;;  %s2009_s24 = smov 123   ;;  %v1885_v3 = vld [vmem:[#allocation2] sm:$0xff]   ;;  %v1887_v5 = vld [vmem:[#allocation2 + $0x8] sm:$0xff]   ;;  %v1889_v7 = vld [vmem:[#allocation2 + $0x10] sm:$0xff]   ;;  %v2102_v36 = vand.u32 127, %v99_v35 }
  0x3a   :  { %s2010_s2 = smov 120   ;;  %s2011_s25 = smov 121   ;;  %1617 = vmatprep.subr.bf16.mxu0 %v1884_v2  ;;  %1649 = vmatprep.subr.bf16.mxu1 %v1885_v3  ;;  %v1890_v8 = vld [vmem:[#allocation2 + $0x58] sm:$0xff]   ;;  %v1892_v10 = vld [vmem:[#allocation2 + $0x60] sm:$0xff]   ;;  %v1894_v12 = vld [vmem:[#allocation2 + $0x68] sm:$0xff]  }
  0x3b   :  { %s2012_s26 = smov 118   ;;  %s2013_s27 = smov 119   ;;  %1618 = vmatpush3.bf16.msra.mxu0 %v1884_v2  ;;  %1650 = vmatpush3.bf16.msra.mxu1 %v1885_v3  ;;  %v1891_v9 = vld [vmem:[#allocation2 + $0x18] sm:$0xff]   ;;  %v1893_v11 = vld [vmem:[#allocation2 + $0x20] sm:$0xff]   ;;  %v1895_v13 = vld [vmem:[#allocation2 + $0x28] sm:$0xff]  }
  0x3c   :  { %s2014_s0 = smov 116   ;;  %s2015_s28 = smov 117   ;;  %1619 = vmatprep.subr.bf16.mxu0 %v1886_v4  ;;  %1651 = vmatprep.subr.bf16.mxu1 %v1887_v5  ;;  %v1896_v16 = vld [vmem:[#allocation2 + $0x70] sm:$0xff]   ;;  %v1898_v20 = vld [vmem:[#allocation2 + $0x78] sm:$0xff]   ;;  %v1900_v24 = vld [vmem:[#allocation2 + $0x80] sm:$0xff]  }
  0x3d   :  { %75 = vrot.lane.b32.xlu1 %v68_v1, %s2006_s22  ;;  %71 = vrot.lane.b32.xlu0 %v68_v1, %s2007_s23  ;;  %s2016_s29 = smov 114   ;;  %s2017_s30 = smov 115   ;;  %v1897_v17 = vld [vmem:[#allocation2 + $0x30] sm:$0xff]   ;;  %v1899_v21 = vld [vmem:[#allocation2 + $0x38] sm:$0xff]   ;;  %v1901_v25 = vld [vmem:[#allocation2 + $0xc0] sm:$0xff]  }
  0x3e   :  { %s2018_s8 = smov 113   ;;  %v2019_v40 = vmov 1.0|1.0   ;;  %v1902_v45 = vld [vmem:[#allocation2 + $0x88] sm:$0xff]   ;;  %v1904_v50 = vld [vmem:[#allocation2 + $0x90] sm:$0xff]   ;;  %v1906_v54 = vld [vmem:[#allocation2 + $0x98] sm:$0xff]  }
  0x3f   :  { %1620 = vmatpush3.bf16.msra.mxu0 %v1886_v4  ;;  %1652 = vmatpush3.bf16.msra.mxu1 %v1887_v5  ;;  %v1903_v46 = vld [vmem:[#allocation2 + $0xc8] sm:$0xff]   ;;  %v1905_v51 = vld [vmem:[#allocation2 + $0xd0] sm:$0xff]   ;;  %v1907_v55 = vld [vmem:[#allocation2 + $0xd8] sm:$0xff]  }
  0x40   :  { %1621 = vmatprep.subr.bf16.mxu0 %v1888_v6  ;;  %1653 = vmatprep.subr.bf16.mxu1 %v1889_v7  ;;  %v1908_v59 = vld [vmem:[#allocation2 + $0xa0] sm:$0xff]   ;;  %v1910_v0 = vld [vmem:[#allocation2 + $0xa8] sm:$0xff]   ;;  %v1912_v4 = vld [vmem:[#allocation2 + $0xb0] sm:$0xff]  }
  0x41   :  { %79 = vrot.lane.b32.xlu1 %v68_v1, %s2008_s3  ;;  %77 = vrot.lane.b32.xlu0 %v68_v1, %s2009_s24  ;;  %v1909_v60 = vld [vmem:[#allocation2 + $0xe0] sm:$0xff]   ;;  %v1913_v5 = vld [vmem:[#allocation2 + $0xf0] sm:$0xff]  }
  0x42   :  { %v1202_v39 = vld [vmem:[#allocation6 + $0x60] sm:$0xff] }
  0x43   :  { %1622 = vmatpush3.bf16.msra.mxu0 %v1888_v6  ;;  %1654 = vmatpush3.bf16.msra.mxu1 %v1889_v7 }
  0x44   :  { %1623 = vmatprep.subr.bf16.mxu0 %v1890_v8  ;;  %1655 = vmatprep.subr.bf16.mxu1 %v1891_v9 }
  0x45   :  { %83 = vrot.lane.b32.xlu1 %v68_v1, %s2010_s2  ;;  %81 = vrot.lane.b32.xlu0 %v68_v1, %s2011_s25 }
  0x47   :  { %1624 = vmatpush3.bf16.msra.mxu0 %v1890_v8  ;;  %1656 = vmatpush3.bf16.msra.mxu1 %v1891_v9 }
  0x48   :  { %1625 = vmatprep.subr.bf16.mxu0 %v1892_v10  ;;  %1657 = vmatprep.subr.bf16.mxu1 %v1893_v11 }
  0x49   :  { %87 = vrot.lane.b32.xlu1 %v68_v1, %s2012_s26  ;;  %85 = vrot.lane.b32.xlu0 %v68_v1, %s2013_s27 }
  0x4b   :  { %1626 = vmatpush3.bf16.msra.mxu0 %v1892_v10  ;;  %1658 = vmatpush3.bf16.msra.mxu1 %v1893_v11  ;;  %v1914_v10 = vld [vmem:[#allocation2 + $0xb8] sm:$0xff]  }
  0x4c   :  { %1627 = vmatprep.subr.bf16.mxu0 %v1894_v12  ;;  %1659 = vmatprep.subr.bf16.mxu1 %v1895_v13  ;;  %v1915_v11 = vld [vmem:[#allocation2 + $0xf8] sm:$0xff]  }
  0x4d   :  { %91 = vrot.lane.b32.xlu1 %v68_v1, %s2014_s0  ;;  %89 = vrot.lane.b32.xlu0 %v68_v1, %s2015_s28 }
  0x4f   :  { %1628 = vmatpush3.bf16.msra.mxu0 %v1894_v12  ;;  %1660 = vmatpush3.bf16.msra.mxu1 %v1895_v13  ;;  %v1916_v12 = vld [vmem:[#allocation2 + $0x100] sm:$0xff]   ;;  %v1917_v13 = vld [vmem:[#allocation2 + $0x108] sm:$0xff]  }
  0x50   :  { %1629 = vmatprep.subr.bf16.mxu0 %v1896_v16  ;;  %1661 = vmatprep.subr.bf16.mxu1 %v1897_v17 }
  0x51   :  { %95 = vrot.lane.b32.xlu1 %v68_v1, %s2016_s29  ;;  %93 = vrot.lane.b32.xlu0 %v68_v1, %s2017_s30 }
  0x53   :  { %1630 = vmatpush3.bf16.msra.mxu0 %v1896_v16  ;;  %1662 = vmatpush3.bf16.msra.mxu1 %v1897_v17  ;;  %v1920_v16 = vld [vmem:[#allocation2 + $0x120] sm:$0xff]   ;;  %v1921_v17 = vld [vmem:[#allocation2 + $0x128] sm:$0xff]  }
  0x54   :  { %1631 = vmatprep.subr.bf16.mxu0 %v1898_v20  ;;  %1663 = vmatprep.subr.bf16.mxu1 %v1899_v21 }
  0x55   :  { %97 = vrot.lane.b32.xlu0 %v68_v1, %s2018_s8  ;;  %102 = vperm.xlu1 %1882, %v68_v1   ;;  %v1911_v1 = vld [vmem:[#allocation2 + $0xe8] sm:$0xff]  }
  0x57   :  { %1632 = vmatpush3.bf16.msra.mxu0 %v1898_v20  ;;  %1664 = vmatpush3.bf16.msra.mxu1 %v1899_v21  ;;  %v1190_v20 = vld [vmem:[#allocation6] sm:$0xff]  ;;  %v1191_v21 = vld [vmem:[#allocation6 + $0x8] sm:$0xff] }
  0x58   :  { %1681 = vmatprep.subr.bf16.mxu0 %v1900_v24  ;;  %1713 = vmatprep.subr.bf16.mxu1 %v1901_v25 }
  0xab   :  { %v74_v14 = vpop.permute.xlu1 %73  ;;  %v70_v15 = vpop.permute.xlu0 %69 }
  0xac   :  { %105 = vperm.xlu0 %1883, %v70_v15   ;;  %v1919_v15 = vld [vmem:[#allocation2 + $0x118] sm:$0xff]  }
  0xaf   :  { %v76_v18 = vpop.permute.xlu1 %75  ;;  %v72_v19 = vpop.permute.xlu0 %71 }
  0xb0   :  { %114 = vperm.xlu0 %1883, %v76_v18   ;;  %108 = vperm.xlu1 %1882, %v72_v19   ;;  %v1922_v18 = vld [vmem:[#allocation2 + $0x130] sm:$0xff]   ;;  %v1923_v19 = vld [vmem:[#allocation2 + $0x138] sm:$0xff]  }
  0xb3   :  { %v80_v22 = vpop.permute.xlu1 %79  ;;  %v78_v23 = vpop.permute.xlu0 %77 }
  0xb4   :  { %120 = vperm.xlu0 %1883, %v80_v22   ;;  %111 = vperm.xlu1 %1882, %v74_v14   ;;  %v1918_v14 = vld [vmem:[#allocation2 + $0x110] sm:$0xff]   ;;  %v1824_v22 = vpack.c.bf16 %v1191_v21, %v1190_v20 }
  0xb7   :  { %v84_v26 = vpop.permute.xlu1 %83  ;;  %v82_v27 = vpop.permute.xlu0 %81 }
  0xb8   :  { %126 = vperm.xlu0 %1883, %v84_v26   ;;  %117 = vperm.xlu1 %1882, %v78_v23   ;;  %v2020_v23 = vmov 0.0|0.0  }
  0xbb   :  { %v88_v28 = vpop.permute.xlu1 %87  ;;  %v86_v29 = vpop.permute.xlu0 %85 }
  0xbc   :  { %132 = vperm.xlu0 %1883, %v88_v28   ;;  %123 = vperm.xlu1 %1882, %v82_v27   ;;  %v1194_v27 = vld [vmem:[#allocation6 + $0x20] sm:$0xff]  ;;  %v1195_v28 = vld [vmem:[#allocation6 + $0x28] sm:$0xff] }
  0xbf   :  { %v92_v30 = vpop.permute.xlu1 %91  ;;  %v90_v31 = vpop.permute.xlu0 %89 }
  0xc0   :  { %138 = vperm.xlu0 %1883, %v92_v30   ;;  %129 = vperm.xlu1 %1882, %v86_v29   ;;  %v1830_v29 = vpack.c.bf16 %v1195_v28, %v1194_v27  ;;  %v1196_v30 = vld [vmem:[#allocation6 + $0x30] sm:$0xff] }
  0xc3   :  { %v96_v32 = vpop.permute.xlu1 %95  ;;  %v94_v33 = vpop.permute.xlu0 %93 }
  0xc4   :  { %144 = vperm.xlu0 %1883, %v96_v32   ;;  %135 = vperm.xlu1 %1882, %v90_v31   ;;  %v1197_v31 = vld [vmem:[#allocation6 + $0x38] sm:$0xff] }
  0xc5   :  { %v1833_v32 = vpack.c.bf16 %v1197_v31, %v1196_v30 }
  0xc7   :  { %v98_v34 = vpop.permute.xlu0 %97 }
  0xc8   :  { %141 = vperm.xlu1 %1882, %v94_v33   ;;  %v1198_v33 = vld [vmem:[#allocation6 + $0x40] sm:$0xff] }
  0xcc   :  { %147 = vperm.xlu1 %1882, %v98_v34   ;;  %v1199_v34 = vld [vmem:[#allocation6 + $0x48] sm:$0xff] }
  0xcd   :  { %v1836_v35 = vpack.c.bf16 %v1199_v34, %v1198_v33 }
  0xd4   :  { %v103_v37 = vpop.permute.xlu1 %102 }
  0xd5   :  { %vm149_vm0 = vcmp.eq.s32.totalorder %v2102_v36, %v103_v37  ;;  %v1201_v37 = vld [vmem:[#allocation6 + $0x58] sm:$0xff] }
 0x12b   :  { %v106_v38 = vpop.permute.xlu0 %105 }
 0x12c   :  { %vm150_vm1 = vcmp.eq.s32.totalorder %v2102_v36, %v106_v38 }
 0x12d   :  { %vm2106_vm2 = vmpackc.low %vm150_vm1, %vm149_vm0 }
 0x12e   :  { %1633 = vmatprep.mubr.msk.bf16.mxu0 %vm2106_vm2, %v2019_v40  ;;  %1665 = vmatprep.mubr.msk.bf16.mxu1 %vm2106_vm2, %v2019_v40 }
 0x12f   :  { %v109_v41 = vpop.permute.xlu1 %108  ;;  %v115_v42 = vpop.permute.xlu0 %114 }
 0x130   :  { %vm151_vm3 = vcmp.eq.s32.totalorder %v2102_v36, %v109_v41  ;;  %vm153_vm6 = vcmp.eq.s32.totalorder %v2102_v36, %v115_v42  ;;  %v1204_v42 = vld [vmem:[#allocation6 + $0x70] sm:$0xff] }
 0x133   :  { %v112_v43 = vpop.permute.xlu1 %111  ;;  %v121_v44 = vpop.permute.xlu0 %120 }
 0x134   :  { %vm152_vm4 = vcmp.eq.s32.totalorder %v2102_v36, %v112_v43  ;;  %vm155_vm9 = vcmp.eq.s32.totalorder %v2102_v36, %v121_v44  ;;  %v1205_v43 = vld [vmem:[#allocation6 + $0x78] sm:$0xff] }
 0x135   :  { %vm2118_vm5 = vmpackc.low %vm152_vm4, %vm151_vm3  ;;  %v1845_v44 = vpack.c.bf16 %v1205_v43, %v1204_v42 }
 0x136   :  { %1634 = vmatmul.mubr.msk.bf16.vlgmr.msra.gmra.mrb[0].mxu0 %vm2118_vm5, %v2019_v40  ;;  %1666 = vmatmul.mubr.msk.bf16.vlgmr.msra.gmra.mrb[0].mxu1 %vm2118_vm5, %v2019_v40 }
 0x137   :  { %1682 = vmatpush3.bf16.msra.mxu0 %v1900_v24  ;;  %v118_v48 = vpop.permute.xlu1 %117  ;;  %1714 = vmatpush3.bf16.msra.mxu1 %v1901_v25  ;;  %v127_v49 = vpop.permute.xlu0 %126  ;;  %v1192_v24 = vld [vmem:[#allocation6 + $0x10] sm:$0xff]  ;;  %v1193_v25 = vld [vmem:[#allocation6 + $0x18] sm:$0xff] }
 0x138   :  { %vm154_vm7 = vcmp.eq.s32.totalorder %v2102_v36, %v118_v48  ;;  %1683 = vmatprep.subr.bf16.mxu0 %v1902_v45  ;;  %1715 = vmatprep.subr.bf16.mxu1 %v1903_v46  ;;  %vm157_vm12 = vcmp.eq.s32.totalorder %v2102_v36, %v127_v49  ;;  %v1827_v26 = vpack.c.bf16 %v1193_v25, %v1192_v24 }
 0x139   :  { %vm2130_vm8 = vmpackc.low %vm154_vm7, %vm153_vm6 }
 0x13a   :  { %1637 = vmatprep.mubr.msk.bf16.mxu0 %vm2130_vm8, %v2019_v40  ;;  %1669 = vmatprep.mubr.msk.bf16.mxu1 %vm2130_vm8, %v2019_v40 }
 0x13b   :  { %1684 = vmatpush3.bf16.msra.mxu0 %v1902_v45  ;;  %v124_v53 = vpop.permute.xlu1 %123  ;;  %1716 = vmatpush3.bf16.msra.mxu1 %v1903_v46  ;;  %v133_v57 = vpop.permute.xlu0 %132  ;;  %v2022_v45 = vmov 0.0  }
 0x13c   :  { %vm156_vm10 = vcmp.eq.s32.totalorder %v2102_v36, %v124_v53  ;;  %1685 = vmatprep.subr.bf16.mxu0 %v1904_v50  ;;  %1717 = vmatprep.subr.bf16.mxu1 %v1905_v51  ;;  %vm159_vm15 = vcmp.eq.s32.totalorder %v2102_v36, %v133_v57 }
 0x13d   :  { %vm2142_vm11 = vmpackc.low %vm156_vm10, %vm155_vm9 }
 0x13e   :  { %1638 = vmatmul.mubr.msk.bf16.gmra.mrb[4].mxu0 %vm2142_vm11, %v2019_v40  ;;  %1670 = vmatmul.mubr.msk.bf16.gmra.mrb[4].mxu1 %vm2142_vm11, %v2019_v40 }
 0x13f   :  { %1686 = vmatpush3.bf16.msra.mxu0 %v1904_v50  ;;  %v130_v58 = vpop.permute.xlu1 %129  ;;  %1718 = vmatpush3.bf16.msra.mxu1 %v1905_v51  ;;  %v139_v62 = vpop.permute.xlu0 %138 }
 0x140   :  { %vm158_vm13 = vcmp.eq.s32.totalorder %v2102_v36, %v130_v58  ;;  %1687 = vmatprep.subr.bf16.mxu0 %v1906_v54  ;;  %1719 = vmatprep.subr.bf16.mxu1 %v1907_v55  ;;  %vm161_vm3 = vcmp.eq.s32.totalorder %v2102_v36, %v139_v62 }
 0x141   :  { %vm2154_vm14 = vmpackc.low %vm158_vm13, %vm157_vm12 }
 0x142   :  { %1641 = vmatprep.mubr.msk.bf16.mxu0 %vm2154_vm14, %v2019_v40  ;;  %1673 = vmatprep.mubr.msk.bf16.mxu1 %vm2154_vm14, %v2019_v40 }
 0x143   :  { %1688 = vmatpush3.bf16.msra.mxu0 %v1906_v54  ;;  %v136_v63 = vpop.permute.xlu1 %135  ;;  %1720 = vmatpush3.bf16.msra.mxu1 %v1907_v55  ;;  %v145_v6 = vpop.permute.xlu0 %144 }
 0x144   :  { %vm160_vm0 = vcmp.eq.s32.totalorder %v2102_v36, %v136_v63  ;;  %1689 = vmatprep.subr.bf16.mxu0 %v1908_v59  ;;  %1721 = vmatprep.subr.bf16.mxu1 %v1909_v60  ;;  %vm163_vm7 = vcmp.eq.s32.totalorder %v2102_v36, %v145_v6 }
 0x145   :  { %vm2166_vm1 = vmpackc.low %vm160_vm0, %vm159_vm15 }
 0x146   :  { %1642 = vmatmul.mubr.msk.bf16.gmra.mrb[8].mxu0 %vm2166_vm1, %v2019_v40  ;;  %1674 = vmatmul.mubr.msk.bf16.gmra.mrb[8].mxu1 %vm2166_vm1, %v2019_v40 }
 0x147   :  { %1690 = vmatpush3.bf16.msra.mxu0 %v1908_v59  ;;  %v142_v3 = vpop.permute.xlu1 %141  ;;  %1722 = vmatpush3.bf16.msra.mxu1 %v1909_v60 }
 0x148   :  { %vm162_vm4 = vcmp.eq.s32.totalorder %v2102_v36, %v142_v3  ;;  %1691 = vmatprep.subr.bf16.mxu0 %v1910_v0  ;;  %1723 = vmatprep.subr.bf16.mxu1 %v1911_v1 }
 0x149   :  { %vm2178_vm6 = vmpackc.low %vm162_vm4, %vm161_vm3 }
 0x14a   :  { %1645 = vmatprep.mubr.msk.bf16.mxu0 %vm2178_vm6, %v2019_v40  ;;  %1677 = vmatprep.mubr.msk.bf16.mxu1 %vm2178_vm6, %v2019_v40 }
 0x14b   :  { %1692 = vmatpush3.bf16.msra.mxu0 %v1910_v0  ;;  %v148_v8 = vpop.permute.xlu1 %147  ;;  %1724 = vmatpush3.bf16.msra.mxu1 %v1911_v1 }
 0x14c   :  { %vm164_vm9 = vcmp.eq.s32.totalorder %v2102_v36, %v148_v8  ;;  %1693 = vmatprep.subr.bf16.mxu0 %v1912_v4  ;;  %1725 = vmatprep.subr.bf16.mxu1 %v1913_v5  ;;  %v1200_v36 = vld [vmem:[#allocation6 + $0x50] sm:$0xff] }
 0x14d   :  { %vm2190_vm10 = vmpackc.low %vm164_vm9, %vm163_vm7  ;;  %v1839_v38 = vpack.c.bf16 %v1201_v37, %v1200_v36 }
 0x14e   :  { %1646 = vmatmul.mubr.msk.bf16.gmra.mrb[12].mxu0 %vm2190_vm10, %v2019_v40  ;;  %1678 = vmatmul.mubr.msk.bf16.gmra.mrb[12].mxu1 %vm2190_vm10, %v2019_v40 }
 0x14f   :  { %1694 = vmatpush3.bf16.msra.mxu0 %v1912_v4  ;;  %1697 = vmatprep.mubr.msk.bf16.mxu0 %vm2106_vm2, %v2019_v40 }
 0x150   :  { %1726 = vmatpush3.bf16.msra.mxu1 %v1913_v5  ;;  %1729 = vmatprep.mubr.msk.bf16.mxu1 %vm2106_vm2, %v2019_v40 }
 0x151   :  { %1695 = vmatprep.subr.bf16.mxu0 %v1914_v10  ;;  %1727 = vmatprep.subr.bf16.mxu1 %v1915_v11 }
 0x153   :  { %1696 = vmatpush3.bf16.msra.mxu0 %v1914_v10 }
 0x154   :  { %1728 = vmatpush3.bf16.msra.mxu1 %v1915_v11  ;;  %1745 = vmatprep.subr.bf16.mxu0 %v1916_v12 }
 0x155   :  { %1823 = vmatprep.subr.bf16.mxu1 %v2020_v23 }
 0x156   :  { %1698 = vmatmul.mubr.msk.bf16.vlgmr.msra.gmra.mrb[16].mxu0 %vm2118_vm5, %v2019_v40 }
 0x157   :  { %1730 = vmatmul.mubr.msk.bf16.vlgmr.msra.gmra.mrb[16].mxu1 %vm2118_vm5, %v2019_v40  ;;  %1746 = vmatpush3.bf16.msra.mxu0 %v1916_v12 }
 0x158   :  { %1701 = vmatprep.mubr.msk.bf16.mxu0 %vm2130_vm8, %v2019_v40  ;;  %1733 = vmatprep.mubr.msk.bf16.mxu1 %vm2130_vm8, %v2019_v40 }
 0x159   :  { %1747 = vmatprep.subr.bf16.mxu0 %v1917_v13  ;;  %1825 = vmatpush3.bf16.msra.mxu1 %v1824_v22 }
 0x15a   :  { %1826 = vmatprep.subr.bf16.mxu1 %v2020_v23 }
 0x15b   :  { %1748 = vmatpush3.bf16.msra.mxu0 %v1917_v13 }
 0x15c   :  { %1749 = vmatprep.subr.bf16.mxu0 %v1918_v14 }
 0x15d   :  { %1828 = vmatpush3.bf16.msra.mxu1 %v1827_v26 }
 0x15e   :  { %1702 = vmatmul.mubr.msk.bf16.gmra.mrb[20].mxu0 %vm2142_vm11, %v2019_v40  ;;  %1829 = vmatprep.subr.bf16.mxu1 %v2020_v23 }
 0x15f   :  { %1734 = vmatmul.mubr.msk.bf16.gmra.mrb[20].mxu1 %vm2142_vm11, %v2019_v40  ;;  %1750 = vmatpush3.bf16.msra.mxu0 %v1918_v14 }
 0x160   :  { %1705 = vmatprep.mubr.msk.bf16.mxu0 %vm2154_vm14, %v2019_v40  ;;  %1737 = vmatprep.mubr.msk.bf16.mxu1 %vm2154_vm14, %v2019_v40 }
 0x161   :  { %1751 = vmatprep.subr.bf16.mxu0 %v1919_v15  ;;  %1831 = vmatpush3.bf16.msra.mxu1 %v1830_v29 }
 0x162   :  { %1832 = vmatprep.subr.bf16.mxu1 %v2020_v23 }
 0x163   :  { %1752 = vmatpush3.bf16.msra.mxu0 %v1919_v15 }
 0x164   :  { %1753 = vmatprep.subr.bf16.mxu0 %v1920_v16 }
 0x165   :  { %1834 = vmatpush3.bf16.msra.mxu1 %v1833_v32 }
 0x166   :  { %1706 = vmatmul.mubr.msk.bf16.gmra.mrb[24].mxu0 %vm2166_vm1, %v2019_v40  ;;  %1835 = vmatprep.subr.bf16.mxu1 %v2020_v23 }
 0x167   :  { %1738 = vmatmul.mubr.msk.bf16.gmra.mrb[24].mxu1 %vm2166_vm1, %v2019_v40  ;;  %1754 = vmatpush3.bf16.msra.mxu0 %v1920_v16 }
 0x168   :  { %1709 = vmatprep.mubr.msk.bf16.mxu0 %vm2178_vm6, %v2019_v40  ;;  %1741 = vmatprep.mubr.msk.bf16.mxu1 %vm2178_vm6, %v2019_v40 }
 0x169   :  { %1755 = vmatprep.subr.bf16.mxu0 %v1921_v17  ;;  %1837 = vmatpush3.bf16.msra.mxu1 %v1836_v35 }
 0x16a   :  { %1838 = vmatprep.subr.bf16.mxu1 %v2020_v23 }
 0x16b   :  { %1756 = vmatpush3.bf16.msra.mxu0 %v1921_v17 }
 0x16c   :  { %1757 = vmatprep.subr.bf16.mxu0 %v1922_v18 }
 0x16d   :  { %1840 = vmatpush3.bf16.msra.mxu1 %v1839_v38 }
 0x16e   :  { %1710 = vmatmul.mubr.msk.bf16.gmra.mrb[28].mxu0 %vm2190_vm10, %v2019_v40  ;;  %1841 = vmatprep.subr.bf16.mxu1 %v2020_v23 }
 0x16f   :  { %1742 = vmatmul.mubr.msk.bf16.gmra.mrb[28].mxu1 %vm2190_vm10, %v2019_v40  ;;  %1758 = vmatpush3.bf16.msra.mxu0 %v1922_v18 }
 0x170   :  { %1761 = vmatprep.mubr.msk.bf16.mxu0 %vm2106_vm2, %v2019_v40  ;;  %1759 = vmatprep.subr.bf16.mxu0 %v1923_v19  ;;  %vm2021_vm2 = vmmov 0  }
 0x171   :  { %1809 = vmatprep.mubr.msk.f32.mxu1 %vm2021_vm2, %v2022_v45 }
 0x173   :  { %1760 = vmatpush3.bf16.msra.mxu0 %v1923_v19 }
 0x176   :  { %1762 = vmatmul.mubr.msk.bf16.vlgmr.msra.gmra.mrb[32].mxu0 %vm2118_vm5, %v2019_v40  ;;  %vm1295_vm5 = vcmask 261120  }
 0x177   :  { %1765 = vmatprep.mubr.msk.bf16.mxu0 %vm2130_vm8, %v2019_v40 }
 0x17e   :  { %1766 = vmatmul.mubr.msk.bf16.gmra.mrb[36].mxu0 %vm2142_vm11, %v2019_v40 }
 0x17f   :  { %1769 = vmatprep.mubr.msk.bf16.mxu0 %vm2154_vm14, %v2019_v40 }
 0x186   :  { %1770 = vmatmul.mubr.msk.bf16.gmra.mrb[40].mxu0 %vm2166_vm1, %v2019_v40 }
 0x187   :  { %1773 = vmatprep.mubr.msk.bf16.mxu0 %vm2178_vm6, %v2019_v40 }
 0x18e   :  { %1774 = vmatmul.mubr.msk.bf16.gmra.mrb[44].mxu0 %vm2190_vm10, %v2019_v40  ;;  %v1203_v40 = vld [vmem:[#allocation6 + $0x68] sm:$0xff] }
 0x18f   :  { %v1842_v41 = vpack.c.bf16 %v1203_v40, %v1202_v39 }
 0x191   :  { %1843 = vmatpush3.bf16.msra.mxu1 %v1842_v41 }
 0x192   :  { %1844 = vmatprep.subr.bf16.mxu1 %v2020_v23 }
 0x195   :  { %1846 = vmatpush3.bf16.msra.mxu1 %v1845_v44 }
 0x196   :  { %1847 = vmatprep.subr.bf16.mxu1 %v2020_v23 }
 0x209   :  { %v1635_v46 = vpop.f32.mrb[0].mxu0  ;;  %v1667_v47 = vpop.f32.mrb[0].mxu1 }
 0x20a   :  { %v304_v48 = vpop.f32.mrb[1].mxu0  ;;  %v449_v49 = vpop.f32.mrb[1].mxu1 }
 0x20b   :  { %v1636_v50 = vpop.f32.mrb[2].mxu0  ;;  %v1668_v51 = vpop.f32.mrb[2].mxu1 }
 0x20c   :  { %v458_v52 = vadd.f32 %v1667_v47, %v1636_v50  ;;  %v307_v53 = vpop.f32.mrb[3].mxu0  ;;  %v452_v54 = vpop.f32.mrb[3].mxu1 }
 0x20d   :  { %v450_v55 = vadd.f32 %v449_v49, %v307_v53  ;;  %v453_v56 = vadd.f32 %v1635_v46, %v452_v54 }
 0x211   :  { %v1639_v57 = vpop.f32.mrb[4].mxu0  ;;  %v1671_v58 = vpop.f32.mrb[4].mxu1 }
 0x212   :  { %v320_v59 = vpop.f32.mrb[5].mxu0  ;;  %v465_v60 = vpop.f32.mrb[5].mxu1 }
 0x213   :  { %v461_v61 = vadd.f32 %v1668_v51, %v320_v59  ;;  %v1640_v62 = vpop.f32.mrb[6].mxu0  ;;  %v1672_v63 = vpop.f32.mrb[6].mxu1 }
 0x214   :  { %v2283_v0 = vadd.f32 %v1671_v58, %v1640_v62  ;;  %v323_v1 = vpop.f32.mrb[7].mxu0  ;;  %v468_v2 = vpop.f32.mrb[7].mxu1 }
 0x215   :  { %v466_v3 = vadd.f32 %v465_v60, %v323_v1  ;;  %v469_v4 = vadd.f32 %v1639_v57, %v468_v2 }
 0x219   :  { %v1643_v5 = vpop.f32.mrb[8].mxu0  ;;  %v1675_v6 = vpop.f32.mrb[8].mxu1 }
 0x21a   :  { %v336_v7 = vpop.f32.mrb[9].mxu0  ;;  %v481_v8 = vpop.f32.mrb[9].mxu1 }
 0x21b   :  { %v2285_v9 = vadd.f32 %v1672_v63, %v336_v7  ;;  %v1644_v10 = vpop.f32.mrb[10].mxu0  ;;  %v1676_v11 = vpop.f32.mrb[10].mxu1 }
 0x21c   :  { %v2287_v12 = vadd.f32 %v1675_v6, %v1644_v10  ;;  %v339_v13 = vpop.f32.mrb[11].mxu0  ;;  %v484_v14 = vpop.f32.mrb[11].mxu1 }
 0x21d   :  { %v482_v15 = vadd.f32 %v481_v8, %v339_v13  ;;  %v485_v16 = vadd.f32 %v1643_v5, %v484_v14 }
 0x221   :  { %v1647_v17 = vpop.f32.mrb[12].mxu0  ;;  %v1679_v18 = vpop.f32.mrb[12].mxu1 }
 0x222   :  { %v352_v19 = vpop.f32.mrb[13].mxu0  ;;  %v497_v20 = vpop.f32.mrb[13].mxu1 }
 0x223   :  { %v2289_v21 = vadd.f32 %v1676_v11, %v352_v19  ;;  %v1648_v22 = vpop.f32.mrb[14].mxu0  ;;  %v1680_v24 = vpop.f32.mrb[14].mxu1 }
 0x224   :  { %v506_v25 = vadd.f32 %v1679_v18, %v1648_v22  ;;  %v509_v26 = vadd.f32 %v1680_v24, %v304_v48  ;;  %v355_v27 = vpop.f32.mrb[15].mxu0  ;;  %v500_v28 = vpop.f32.mrb[15].mxu1 }
 0x225   :  { %v498_v29 = vadd.f32 %v497_v20, %v355_v27  ;;  %v501_v30 = vadd.f32 %v1647_v17, %v500_v28 }
 0x229   :  { %v1699_v31 = vpop.f32.mrb[16].mxu0 }
 0x22a   :  { %v674_v32 = vadd.f32 %v1699_v31, %v450_v55  ;;  %v1731_v33 = vpop.f32.mrb[16].mxu1  ;;  %v611_v34 = vpop.f32.mrb[17].mxu0 }
 0x22b   :  { %v688_v35 = vadd.f32 %v611_v34, %v506_v25  ;;  %v789_v36 = vpop.f32.mrb[17].mxu1  ;;  %v1700_v37 = vpop.f32.mrb[18].mxu0 }
 0x22c   :  { %v675_v38 = vadd.f32 %v1700_v37, %v453_v56  ;;  %v1732_v39 = vpop.f32.mrb[18].mxu1  ;;  %v614_v40 = vpop.f32.mrb[19].mxu0 }
 0x22d   :  { %v2291_v41 = vadd.f32 %v1732_v39, %v674_v32  ;;  %v689_v42 = vadd.f32 %v614_v40, %v509_v26  ;;  %v792_v43 = vpop.f32.mrb[19].mxu1 }
 0x22e   :  { %v866_v44 = vadd.f32 %v792_v43, %v688_v35 }
 0x22f   :  { %v867_v46 = vadd.f32 %v1731_v33, %v689_v42 }
 0x231   :  { %v1703_v47 = vpop.f32.mrb[20].mxu0 }
 0x232   :  { %v678_v48 = vadd.f32 %v1703_v47, %v466_v3  ;;  %v1735_v49 = vpop.f32.mrb[20].mxu1  ;;  %v627_v50 = vpop.f32.mrb[21].mxu0 }
 0x233   :  { %v676_v51 = vadd.f32 %v627_v50, %v458_v52  ;;  %v805_v53 = vpop.f32.mrb[21].mxu1  ;;  %v1704_v54 = vpop.f32.mrb[22].mxu0 }
 0x234   :  { %v853_v55 = vadd.f32 %v805_v53, %v675_v38  ;;  %v679_v57 = vadd.f32 %v1704_v54, %v469_v4  ;;  %v1736_v58 = vpop.f32.mrb[22].mxu1  ;;  %v630_v59 = vpop.f32.mrb[23].mxu0  ;;  %v1498_v54 = vld [vmem:[#allocation4 + $0x2] ss:$0 sm:$0xff] }
 0x235   :  { %v856_v56 = vadd.f32 %v1736_v58, %v678_v48  ;;  %v677_v60 = vadd.f32 %v630_v59, %v461_v61  ;;  %v808_v62 = vpop.f32.mrb[23].mxu1  ;;  %v1496_v58 = vld [vmem:[#allocation4] ss:$0 sm:$0xff] }
 0x236   :  { %v854_v63 = vadd.f32 %v808_v62, %v676_v51  ;;  %v1499_v62 = vld [vmem:[#allocation4 + $0x3] ss:$0 sm:$0xff] }
 0x237   :  { %v855_v1 = vadd.f32 %v1735_v49, %v677_v60 }
 0x239   :  { %v1707_v2 = vpop.f32.mrb[24].mxu0 }
 0x23a   :  { %v682_v5 = vadd.f32 %v1707_v2, %v482_v15  ;;  %v1739_v6 = vpop.f32.mrb[24].mxu1  ;;  %v643_v7 = vpop.f32.mrb[25].mxu0 }
 0x23b   :  { %v680_v3 = vadd.f32 %v643_v7, %v2283_v0  ;;  %v821_v8 = vpop.f32.mrb[25].mxu1  ;;  %v1708_v10 = vpop.f32.mrb[26].mxu0 }
 0x23c   :  { %v857_v52 = vadd.f32 %v821_v8, %v679_v57  ;;  %v683_v11 = vadd.f32 %v1708_v10, %v485_v16  ;;  %v1740_v13 = vpop.f32.mrb[26].mxu1  ;;  %v646_v14 = vpop.f32.mrb[27].mxu0  ;;  %v1501_v10 = vld [vmem:[#allocation4 + $0x5] ss:$0 sm:$0xff] }
 0x23d   :  { %v2294_v4 = vadd.f32 %v1740_v13, %v682_v5  ;;  %v681_v17 = vadd.f32 %v646_v14, %v2285_v9  ;;  %v824_v61 = vpop.f32.mrb[27].mxu1 }
 0x23e   :  { %v858_v18 = vadd.f32 %v824_v61, %v680_v3 }
 0x23f   :  { %v859_v19 = vadd.f32 %v1739_v6, %v681_v17  ;;  %v1503_v6 = vld [vmem:[#allocation4 + $0x7] ss:$0 sm:$0xff] }
 0x241   :  { %v1711_v20 = vpop.f32.mrb[28].mxu0 }
 0x242   :  { %v686_v22 = vadd.f32 %v1711_v20, %v498_v29  ;;  %v1743_v15 = vpop.f32.mrb[28].mxu1  ;;  %v659_v24 = vpop.f32.mrb[29].mxu0 }
 0x243   :  { %v684_v25 = vadd.f32 %v659_v24, %v2287_v12  ;;  %v837_v0 = vpop.f32.mrb[29].mxu1  ;;  %v1712_v26 = vpop.f32.mrb[30].mxu0  ;;  %v1506_v24 = vld [vmem:[#allocation4 + $0xa] ss:$0 sm:$0xff] }
 0x244   :  { %v2298_v27 = vadd.f32 %v837_v0, %v683_v11  ;;  %v687_v16 = vadd.f32 %v1712_v26, %v501_v30  ;;  %v1744_v28 = vpop.f32.mrb[30].mxu1  ;;  %v662_v31 = vpop.f32.mrb[31].mxu0  ;;  %v1504_v26 = vld [vmem:[#allocation4 + $0x8] ss:$0 sm:$0xff] }
 0x245   :  { %v864_v32 = vadd.f32 %v1744_v28, %v686_v22  ;;  %v685_v33 = vadd.f32 %v662_v31, %v2289_v21  ;;  %v840_v9 = vpop.f32.mrb[31].mxu1  ;;  %v1507_v31 = vld [vmem:[#allocation4 + $0xb] ss:$0 sm:$0xff] }
 0x246   :  { %v862_v34 = vadd.f32 %v840_v9, %v684_v25  ;;  %v865_v35 = vadd.f32 %v789_v36, %v687_v16  ;;  %v1510_v16 = vld [vmem:[#allocation4 + $0xe] ss:$0 sm:$0xff] }
 0x247   :  { %v863_v37 = vadd.f32 %v1743_v15, %v685_v33 }
 0x249   :  { %v1763_v38 = vpop.f32.mrb[32].mxu0 }
 0x24a   :  { %v1044_v29 = vadd.f32 %v1763_v38, %v866_v44  ;;  %v967_v39 = vpop.f32.mrb[33].mxu0  ;;  %v1502_v44 = vld [vmem:[#allocation4 + $0x6] ss:$0 sm:$0xff]  ;;  %v1511_v38 = vld [vmem:[#allocation4 + $0xf] ss:$0 sm:$0xff] }
 0x24b   :  { %v1042_v40 = vadd.f32 %v967_v39, %v864_v32  ;;  %v1764_v42 = vpop.f32.mrb[34].mxu0  ;;  %v1508_v32 = vld [vmem:[#allocation4 + $0xc] ss:$0 sm:$0xff] }
 0x24c   :  { %v2301_v12 = vadd.f32 %v1764_v42, %v867_v46  ;;  %v970_v43 = vpop.f32.mrb[35].mxu0  ;;  %v1500_v46 = vld [vmem:[#allocation4 + $0x4] ss:$0 sm:$0xff] }
 0x24d   :  { %v2303_v47 = vadd.f32 %v970_v43, %v865_v35  ;;  %v1505_v35 = vld [vmem:[#allocation4 + $0x9] ss:$0 sm:$0xff]  ;;  %v1172_v43 = vadd.f32 %v1510_v16, %v1044_v29 }
 0x24e   :  { %v1285_v29 = vld [vmem:[%s2339_s5 + $0x8] sm:$0xff] }
 0x251   :  { %v1767_v30 = vpop.f32.mrb[36].mxu0 }
 0x252   :  { %v1032_v48 = vadd.f32 %v1767_v30, %v854_v63  ;;  %v983_v49 = vpop.f32.mrb[37].mxu0  ;;  %v1497_v63 = vld [vmem:[#allocation4 + $0x1] ss:$0 sm:$0xff]  ;;  %v1509_v30 = vld [vmem:[#allocation4 + $0xd] ss:$0 sm:$0xff] }
 0x253   :  { %v1030_v50 = vadd.f32 %v983_v49, %v2291_v41  ;;  %v1768_v21 = vpop.f32.mrb[38].mxu0  ;;  %v1170_v49 = vadd.f32 %v1508_v32, %v1042_v40 }
 0x254   :  { %v1033_v51 = vadd.f32 %v1768_v21, %v855_v1  ;;  %v986_v53 = vpop.f32.mrb[39].mxu0  ;;  %v1160_v7 = vadd.f32 %v1498_v54, %v1032_v48 }
 0x255   :  { %v1031_v36 = vadd.f32 %v986_v53, %v853_v55  ;;  %v1158_v1 = vadd.f32 %v1496_v58, %v1030_v50 }
 0x256   :  { %v1161_v13 = vadd.f32 %v1499_v62, %v1033_v51 }
 0x257   :  { %v1159_v61 = vadd.f32 %v1497_v63, %v1031_v36  ;;  %v1171_v36 = vadd.f32 %v1509_v30, %v2303_v47  ;;  %v1286_v47 = vld [vmem:[%s2339_s5 + $0x10] sm:$0xff] }
 0x259   :  { %v1771_v57 = vpop.f32.mrb[40].mxu0 }
 0x25a   :  { %v1036_v59 = vadd.f32 %v1771_v57, %v858_v18  ;;  %v999_v60 = vpop.f32.mrb[41].mxu0 }
 0x25b   :  { %v1034_v2 = vadd.f32 %v999_v60, %v856_v56  ;;  %v1772_v5 = vpop.f32.mrb[42].mxu0 }
 0x25c   :  { %v1164_v3 = vadd.f32 %v1502_v44, %v1036_v59  ;;  %v1037_v8 = vadd.f32 %v1772_v5, %v859_v19  ;;  %v1002_v41 = vpop.f32.mrb[43].mxu0 }
 0x25d   :  { %v1162_v11 = vadd.f32 %v1500_v46, %v1034_v2  ;;  %v1035_v55 = vadd.f32 %v1002_v41, %v857_v52  ;;  %v1287_v46 = vld [vmem:[%s2339_s5 + $0x18] sm:$0xff]  ;;  %v1512_v2 = vld [vmem:[%s2338_s4] ss:$0 sm:$0xff] }
 0x25e   :  { %v1176_v14 = vmax.f32 %v1160_v7, %v1164_v3  ;;  %v1165_v17 = vadd.f32 %v1503_v6, %v1037_v8  ;;  %v1851_v62 = vpack.c.bf16 %v1287_v46, %v1286_v47 }
 0x25f   :  { %v1174_v18 = vmax.f32 %v1158_v1, %v1162_v11  ;;  %v1163_v20 = vadd.f32 %v1501_v10, %v1035_v55 }
 0x260   :  { %v1177_v22 = vmax.f32 %v1161_v13, %v1165_v17 }
 0x261   :  { %v1175_v15 = vmax.f32 %v1159_v61, %v1163_v20  ;;  %v1775_v56 = vpop.f32.mrb[44].mxu0 }
 0x262   :  { %v1040_v25 = vadd.f32 %v1775_v56, %v862_v34  ;;  %v1015_v0 = vpop.f32.mrb[45].mxu0 }
 0x263   :  { %v1038_v19 = vadd.f32 %v1015_v0, %v2294_v4  ;;  %v1776_v28 = vpop.f32.mrb[46].mxu0  ;;  %v1173_v4 = vadd.f32 %v1511_v38, %v2301_v12 }
 0x264   :  { %v1168_v52 = vadd.f32 %v1506_v24, %v1040_v25  ;;  %v1041_v33 = vadd.f32 %v1776_v28, %v863_v37  ;;  %v1018_v9 = vpop.f32.mrb[47].mxu0 }
 0x265   :  { %v1166_v39 = vadd.f32 %v1504_v26, %v1038_v19  ;;  %v1039_v42 = vadd.f32 %v1018_v9, %v2298_v27  ;;  %v1284_v27 = vld [vmem:[%s2339_s5] sm:$0xff] }
 0x266   :  { %v1180_v48 = vmax.f32 %v1176_v14, %v1168_v52  ;;  %v1169_v34 = vadd.f32 %v1507_v31, %v1041_v33  ;;  %v1848_v12 = vpack.c.bf16 %v1285_v29, %v1284_v27 }
 0x267   :  { %v1178_v50 = vmax.f32 %v1174_v18, %v1166_v39  ;;  %v1167_v21 = vadd.f32 %v1505_v35, %v1039_v42 }
 0x268   :  { %v1184_v51 = vmax.f32 %v1180_v48, %v1172_v43  ;;  %v1181_v53 = vmax.f32 %v1177_v22, %v1169_v34 }
 0x269   :  { %v1182_v37 = vmax.f32 %v1178_v50, %v1170_v49  ;;  %v1179_v54 = vmax.f32 %v1175_v15, %v1167_v21 }
 0x26a   :  { %v1185_v57 = vmax.f32 %v1181_v53, %v1173_v4 }
 0x26b   :  { %v1183_v44 = vmax.f32 %v1179_v54, %v1171_v36 }
 0x26c   :  { %v1187_v58 = vmax.f32 %v1184_v51, %v1185_v57 }
 0x26d   :  { %v1186_v59 = vmax.f32 %v1182_v37, %v1183_v44 }
 0x26f   :  { %v1188_v40 = vmax.f32 %v1186_v59, %v1187_v58 }
 0x271   :  { %v1189_v60 = vmax.f32 %v1188_v40, 0.0 }
 0x273   :  { %1810 = vmatmul.mubr.f32.vlgmr.msra.gmra.mrb[32].mxu1 %v1189_v60 }
 0x274   :  { %1849 = vmatpush3.bf16.msra.mxu1 %v1848_v12  ;;  %1820 = vmatprep.mubr.msk.f32.mxu1 %vm2021_vm2, %v2022_v45 }
 0x275   :  { %1850 = vmatprep.subr.bf16.mxu1 %v2020_v23  ;;  %v1513_v23 = vld [vmem:[%s2340_s6] ss:$0 sm:$0xff] }
 0x278   :  { %1852 = vmatpush3.bf16.msra.mxu1 %v1851_v62 }
 0x346   :  { %v1279_v5 = vpop.f32.mrb[32].mxu1 }
 0x347   :  { %v1280_v6 = vadd.f32 %v1512_v2, %v1279_v5  ;;  %v1811_v7 = vpop.f32.mrb[33].mxu1 }
 0x349   :  { %v1283_v45 = vmax.f32 %v1280_v6, 0.0 }
 0x34b   :  { %1821 = vmatmul.mubr.msk.f32.vlgmr.msra.gmra.mrb[34].mxu1 %vm1295_vm5, %v1283_v45 }
 0x41e   :  { %v1365_v63 = vpop.f32.mrb[34].mxu1 }
 0x41f   :  { %v1366_v3 = vadd.f32 %v1513_v23, %v1365_v63  ;;  %v1822_v8 = vpop.f32.mrb[35].mxu1 }
 0x421   :  { %1369 = vst [vmem:[%s2341_s7] sm:$0xff] %v1366_v3 }
 0x422   :  { %1374 = vsyncpa [#allocation3], 1 }
 0x423   :  { %1375 = vsyncpa [#allocation5], 1 }

</bundles_post_ra>
